<compile_context>
chip_gen: v6e
topology: v6e:2x2x1
jax: 0.10.0
libtpu: 0.0.40
codegen_flags: <defaults>
</compile_context>

<pallas_src>
import functools

import jax
import jax.numpy as jnp
from jax.experimental import pallas as pl
from jax.experimental.pallas import tpu as pltpu


DEFAULT_TILE_K = 512


def _round_up(x, m):
    return (x + m - 1) // m * m


# ---------------------------------------------------------------------------
# Kernel
# ---------------------------------------------------------------------------
def ffn_kernel(x_ref, w1_ref, b1_ref, w2_ref, b2_ref, o_ref, acc_ref):
    """One (tile_m, D_pad) output tile, reduced over d_ff chunks on grid axis 1."""
    k = pl.program_id(1)

    # Initialise the resident f32 accumulator with the broadcast second bias so
    # the epilogue never pays a separate full-width bias pass.
    @pl.when(k == 0)
    def _():
        acc_ref[...] = jnp.broadcast_to(
            b2_ref[...].astype(jnp.float32), acc_ref.shape
        )

    # (tile_m, D_pad) @ (D_pad, tk) -> f32 on the MXU.
    h = jnp.dot(x_ref[...], w1_ref[...], preferred_element_type=jnp.float32)
    h = jnp.maximum(h + b1_ref[...].astype(jnp.float32), 0.0)
    # TODO(synk): dropout is identity here (eval-mode semantics); training-mode
    # dropout would mask `h` via pltpu.prng_seed + pltpu.prng_random_bits.
    acc_ref[...] += jnp.dot(
        h.astype(w2_ref.dtype), w2_ref[...], preferred_element_type=jnp.float32
    )

    @pl.when(k == pl.num_programs(1) - 1)
    def _():
        o_ref[...] = acc_ref[...].astype(o_ref.dtype)


# ---------------------------------------------------------------------------
# Hardware-aware defaults
# ---------------------------------------------------------------------------
@functools.lru_cache(maxsize=None)
def _hardware_defaults():
    """(tile_m, vmem_limit_bytes) derived from the chip's physical VMEM."""
    try:
        vmem_cap = int(pltpu.get_tpu_info().vmem_capacity_bytes)
    except Exception:  # pragma: no cover - conservative fallback (v7x-sized)
        vmem_cap = 64 * 1024 * 1024
    vmem_limit = int(0.82 * vmem_cap)  # headroom for compiler-internal scratch
    # Arithmetic intensity per streamed weight byte ~ tile_m rows. 128 MiB parts
    # (v5e/v6e, high FLOP/byte ridge) get 1024-row tiles; 64 MiB parts (v7x,
    # ~3.2 TB/s HBM) are compute-bound already at ~512 rows.
    tile_m = 1024 if vmem_cap > 96 * 1024 * 1024 else 512
    return tile_m, vmem_limit


# ---------------------------------------------------------------------------
# One-time (init-time) parameter preparation -- hoisted out of the forward path
# ---------------------------------------------------------------------------
def prepare_ffn_params(w1, b1, w2, b2, *, compute_dtype=jnp.bfloat16,
                       tile_k=DEFAULT_TILE_K):
    """Pad weights to MXU/lane-friendly shapes and cast once (not per forward).

    Weights are stored (in_features, out_features) -- transposed relative to
    torch.nn.Linear.weight -- so the kernel computes x @ W directly.
    """
    D, F = w1.shape
    D_pad = _round_up(D, 256)  # full 256-wide systolic passes on v6e/v7x
    tk = max(256, _round_up(min(tile_k, _round_up(F, 256)), 256))
    F_pad = _round_up(F, tk)   # tk always divides F_pad -> tk never shrinks
    wdt = w1.dtype if compute_dtype is None else compute_dtype
    w1p = jnp.pad(w1, ((0, D_pad - D), (0, F_pad - F))).astype(wdt)
    b1p = jnp.pad(b1, ((0, F_pad - F),)).reshape(1, F_pad).astype(jnp.float32)
    w2p = jnp.pad(w2, ((0, F_pad - F), (0, D_pad - D))).astype(wdt)
    b2p = jnp.pad(b2, ((0, D_pad - D),)).reshape(1, D_pad).astype(jnp.float32)
    return w1p, b1p, w2p, b2p


# ---------------------------------------------------------------------------
# Forward
# ---------------------------------------------------------------------------
@functools.partial(
    jax.jit, static_argnames=("tile_m", "tile_k", "vmem_limit_bytes"))
def _ffn_forward(x, w1p, b1p, w2p, b2p, *, tile_m, tile_k, vmem_limit_bytes):
    B, S, D = x.shape
    M = B * S
    D_pad, F_pad = w1p.shape
    out_dtype = x.dtype

    # d_ff chunk: >= 256, multiple of 256, divides F_pad (guaranteed by prep).
    tk = max(256, _round_up(min(tile_k, F_pad), 256))
    while tk > 256 and F_pad % tk:
        tk -= 256
    if F_pad % tk:  # weights not pre-padded via prepare_ffn_params
        tk = F_pad

    # Row tile: balance ceil(M / tile_m) equal tiles so M padding stays <= 15.
    base_tm = max(16, _round_up(tile_m, 16))
    nt = -(-M // base_tm)
    tm = _round_up(-(-M // nt), 16)
    M_pad = nt * tm

    # Activations: cast to the weight compute dtype (bf16 by default) and pad
    # only if needed (no extra copy in the aligned fast path).
    xm = x.reshape(M, D).astype(w1p.dtype)
    if M_pad != M or D_pad != D:
        xm = jnp.pad(xm, ((0, M_pad - M), (0, D_pad - D)))

    grid = (nt, F_pad // tk)

    out = pl.pallas_call(
        ffn_kernel,
        out_shape=jax.ShapeDtypeStruct((M_pad, D_pad), out_dtype),
        grid_spec=pltpu.PrefetchScalarGridSpec(
            num_scalar_prefetch=0,
            grid=grid,
            in_specs=[
                pl.BlockSpec((tm, D_pad), lambda i, k: (i, 0)),   # x row tile
                pl.BlockSpec((D_pad, tk), lambda i, k: (0, k)),   # w1 d_ff chunk
                pl.BlockSpec((1, tk), lambda i, k: (0, k)),       # b1 d_ff chunk
                pl.BlockSpec((tk, D_pad), lambda i, k: (k, 0)),   # w2 d_ff chunk
                pl.BlockSpec((1, D_pad), lambda i, k: (0, 0)),    # b2 (invariant)
            ],
            out_specs=pl.BlockSpec((tm, D_pad), lambda i, k: (i, 0)),
            scratch_shapes=[pltpu.VMEM((tm, D_pad), jnp.float32)],
        ),
        compiler_params=pltpu.CompilerParams(
            # M tiles independent (megacore-shardable on v7x); d_ff reduction
            # axis last + 'arbitrary' keeps the accumulator resident across it.
            dimension_semantics=("parallel", "arbitrary"),
            vmem_limit_bytes=vmem_limit_bytes,
        ),
    )(xm, w1p, b1p, w2p, b2p)

    if M_pad != M or D_pad != D:
        out = out[:M, :D]
    return out.reshape(B, S, D)


def feed_forward_block(x, w1p, b1p, w2p, b2p, *, tile_m=None,
                       tile_k=DEFAULT_TILE_K, vmem_limit_bytes=None):
    """x: (batch, seq, d_model) -> (batch, seq, d_model).

    Expects weights already padded/cast by prepare_ffn_params (done once at
    parameter-init time, not on every forward call).
    """
    hw_tm, hw_vmem = _hardware_defaults()
    tile_m = hw_tm if tile_m is None else tile_m
    vmem_limit_bytes = hw_vmem if vmem_limit_bytes is None else vmem_limit_bytes
    return _ffn_forward(x, w1p, b1p, w2p, b2p, tile_m=tile_m, tile_k=tile_k,
                        vmem_limit_bytes=vmem_limit_bytes)


def init_params(key, d_model, d_ff, dtype=jnp.float32):
    """Deterministic init matching nn.Linear shapes (uniform +-1/sqrt(fan_in))."""
    k1, k2, k3, k4 = jax.random.split(key, 4)
    bound1 = 1.0 / (d_model ** 0.5)
    bound2 = 1.0 / (d_ff ** 0.5)
    # Stored (in_features, out_features) so the kernel computes x @ W (== x @ W_pt.T).
    w1 = jax.random.uniform(k1, (d_model, d_ff), dtype, -bound1, bound1)
    b1 = jax.random.uniform(k2, (d_ff,), dtype, -bound1, bound1)
    w2 = jax.random.uniform(k3, (d_ff, d_model), dtype, -bound2, bound2)
    b2 = jax.random.uniform(k4, (d_model,), dtype, -bound2, bound2)
    return w1, b1, w2, b2


if __name__ == "__main__":
    key = jax.random.PRNGKey(0)
    kx, kp = jax.random.split(key)

    batch, seq, d_model, d_ff = 2, 8, 32, 64
    x = jax.random.normal(kx, (batch, seq, d_model), dtype=jnp.float32)
    w1, b1, w2, b2 = init_params(kp, d_model, d_ff)

    # Reference (eval-mode dropout == identity).
    ref = jnp.maximum(x @ w1 + b1, 0.0) @ w2 + b2

    # Default path: bf16 weights/activations, f32 accumulation (looser check).
    params_bf16 = prepare_ffn_params(w1, b1, w2, b2)          # init-time prep
    out_bf16 = jax.block_until_ready(feed_forward_block(x, *params_bf16))
    assert out_bf16.shape == (batch, seq, d_model)
    assert out_bf16.dtype == x.dtype
    assert jnp.allclose(out_bf16, ref, atol=5e-2, rtol=5e-2)

    # Full-precision path for a tight numerical check.
    params_f32 = prepare_ffn_params(w1, b1, w2, b2, compute_dtype=None)
    out_f32 = jax.block_until_ready(feed_forward_block(x, *params_f32))
    assert out_f32.shape == (batch, seq, d_model)
    assert jnp.allclose(out_f32, ref, atol=1e-5, rtol=1e-5)

    print("KERNEL_OK")
</pallas_src>

<mosaic_0001>
module attributes {stable_mosaic.version = 11 : i64} {
  func.func @ffn_kernel(%arg0: i32, %arg1: i32, %arg2: memref<16x256xbf16, #tpu.memory_space<vmem>>, %arg3: memref<256x256xbf16, #tpu.memory_space<vmem>>, %arg4: memref<1x256xf32, #tpu.memory_space<vmem>>, %arg5: memref<256x256xbf16, #tpu.memory_space<vmem>>, %arg6: memref<1x256xf32, #tpu.memory_space<vmem>>, %arg7: memref<16x256xf32, #tpu.memory_space<vmem>>, %arg8: memref<16x256xf32, #tpu.memory_space<vmem>>) attributes {dimension_semantics = [#tpu.dimension_semantics<parallel>, #tpu.dimension_semantics<arbitrary>], iteration_bounds = array<i64: 1, 1>, scalar_prefetch = 0 : i64, scratch_operands = 1 : i64, tpu.core_type = #tpu.core_type<tc>, window_params = [{transform_indices = @transform_0, window_bounds = array<i64: 16, 256>}, {transform_indices = @transform_1, window_bounds = array<i64: 256, 256>}, {transform_indices = @transform_2, window_bounds = array<i64: 1, 256>}, {transform_indices = @transform_3, window_bounds = array<i64: 256, 256>}, {pipeline_mode = #tpu.pipeline_mode<synchronous>, transform_indices = @transform_4, window_bounds = array<i64: 1, 256>}, {transform_indices = @transform_5, window_bounds = array<i64: 16, 256>}]} {
    %c0_i32 = arith.constant 0 : i32
    %0 = arith.cmpi eq, %arg1, %c0_i32 : i32
    %1 = arith.extui %0 : i1 to i32
    %c0_i32_0 = arith.constant 0 : i32
    %2 = arith.cmpi ne, %1, %c0_i32_0 : i32
    scf.if %2 {
      %c0_16 = arith.constant 0 : index
      %c0_17 = arith.constant 0 : index
      %20 = vector.load %arg6[%c0_16, %c0_17] : memref<1x256xf32, #tpu.memory_space<vmem>>, vector<1x256xf32>
      %21 = vector.shape_cast %20 : vector<1x256xf32> to vector<1x256xf32>
      %22 = vector.broadcast %21 : vector<1x256xf32> to vector<16x256xf32>
      %c0_18 = arith.constant 0 : index
      %c0_19 = arith.constant 0 : index
      %23 = vector.load %arg8[%c0_18, %c0_19] : memref<16x256xf32, #tpu.memory_space<vmem>>, vector<16x256xf32>
      tpu.vector_store %arg8[%c0_18, %c0_19], %22 {strides = array<i32>} : memref<16x256xf32, #tpu.memory_space<vmem>>, vector<16x256xf32>,
    } else {
    }
    %c0 = arith.constant 0 : index
    %c0_1 = arith.constant 0 : index
    %3 = vector.load %arg2[%c0, %c0_1] : memref<16x256xbf16, #tpu.memory_space<vmem>>, vector<16x256xbf16>
    %c0_2 = arith.constant 0 : index
    %c0_3 = arith.constant 0 : index
    %4 = vector.load %arg3[%c0_2, %c0_3] : memref<256x256xbf16, #tpu.memory_space<vmem>>, vector<256x256xbf16>
    %cst = arith.constant dense<0.000000e+00> : vector<16x256xf32>
    %5 = tpu.matmul %3, %4, %cst {dimension_numbers = #tpu.dot_dimension_numbers<[1], [0], [0], [1], [0, 0, 1, 1], [], []>} : vector<16x256xbf16>, vector<256x256xbf16>, vector<16x256xf32> -> vector<16x256xf32>
    %c0_4 = arith.constant 0 : index
    %c0_5 = arith.constant 0 : index
    %6 = vector.load %arg4[%c0_4, %c0_5] : memref<1x256xf32, #tpu.memory_space<vmem>>, vector<1x256xf32>
    %7 = vector.broadcast %6 : vector<1x256xf32> to vector<16x256xf32>
    %8 = arith.addf %5, %7 : vector<16x256xf32>
    %cst_6 = arith.constant 0.000000e+00 : f32
    %9 = vector.broadcast %cst_6 : f32 to vector<16x256xf32>
    %10 = arith.maximumf %8, %9 : vector<16x256xf32>
    %c0_7 = arith.constant 0 : index
    %c0_8 = arith.constant 0 : index
    %11 = vector.load %arg8[%c0_7, %c0_8] : memref<16x256xf32, #tpu.memory_space<vmem>>, vector<16x256xf32>
    %12 = arith.truncf %10 : vector<16x256xf32> to vector<16x256xbf16>
    %c0_9 = arith.constant 0 : index
    %c0_10 = arith.constant 0 : index
    %13 = vector.load %arg5[%c0_9, %c0_10] : memref<256x256xbf16, #tpu.memory_space<vmem>>, vector<256x256xbf16>
    %cst_11 = arith.constant dense<0.000000e+00> : vector<16x256xf32>
    %14 = tpu.matmul %12, %13, %cst_11 {dimension_numbers = #tpu.dot_dimension_numbers<[1], [0], [0], [1], [0, 0, 1, 1], [], []>} : vector<16x256xbf16>, vector<256x256xbf16>, vector<16x256xf32> -> vector<16x256xf32>
    %15 = arith.addf %11, %14 : vector<16x256xf32>
    %c0_12 = arith.constant 0 : index
    %c0_13 = arith.constant 0 : index
    %16 = vector.load %arg8[%c0_12, %c0_13] : memref<16x256xf32, #tpu.memory_space<vmem>>, vector<16x256xf32>
    tpu.vector_store %arg8[%c0_12, %c0_13], %15 {strides = array<i32>} : memref<16x256xf32, #tpu.memory_space<vmem>>, vector<16x256xf32>,
    %c0_i32_14 = arith.constant 0 : i32
    %17 = arith.cmpi eq, %arg1, %c0_i32_14 : i32
    %18 = arith.extui %17 : i1 to i32
    %c0_i32_15 = arith.constant 0 : i32
    %19 = arith.cmpi ne, %18, %c0_i32_15 : i32
    scf.if %19 {
      %c0_16 = arith.constant 0 : index
      %c0_17 = arith.constant 0 : index
      %20 = vector.load %arg8[%c0_16, %c0_17] : memref<16x256xf32, #tpu.memory_space<vmem>>, vector<16x256xf32>
      %c0_18 = arith.constant 0 : index
      %c0_19 = arith.constant 0 : index
      %21 = vector.load %arg7[%c0_18, %c0_19] : memref<16x256xf32, #tpu.memory_space<vmem>>, vector<16x256xf32>
      tpu.vector_store %arg7[%c0_18, %c0_19], %20 {strides = array<i32>} : memref<16x256xf32, #tpu.memory_space<vmem>>, vector<16x256xf32>,
    } else {
    }
    return
  }
  func.func @transform_0(%arg0: i32, %arg1: i32) -> (i32, i32) {
    %c0_i32 = arith.constant 0 : i32
    %c0_i32_0 = arith.constant 0 : i32
    return %arg0, %c0_i32 : i32, i32
  }
  func.func @transform_1(%arg0: i32, %arg1: i32) -> (i32, i32) {
    %c0_i32 = arith.constant 0 : i32
    %c0_i32_0 = arith.constant 0 : i32
    return %c0_i32, %arg1 : i32, i32
  }
  func.func @transform_2(%arg0: i32, %arg1: i32) -> (i32, i32) {
    %c0_i32 = arith.constant 0 : i32
    %c0_i32_0 = arith.constant 0 : i32
    return %c0_i32, %arg1 : i32, i32
  }
  func.func @transform_3(%arg0: i32, %arg1: i32) -> (i32, i32) {
    %c0_i32 = arith.constant 0 : i32
    %c0_i32_0 = arith.constant 0 : i32
    return %arg1, %c0_i32 : i32, i32
  }
  func.func @transform_4(%arg0: i32, %arg1: i32) -> (i32, i32) {
    %c0_i32 = arith.constant 0 : i32
    %c0_i32_0 = arith.constant 0 : i32
    %c0_i32_1 = arith.constant 0 : i32
    return %c0_i32, %c0_i32_0 : i32, i32
  }
  func.func @transform_5(%arg0: i32, %arg1: i32) -> (i32, i32) {
    %c0_i32 = arith.constant 0 : i32
    %c0_i32_0 = arith.constant 0 : i32
    return %arg0, %c0_i32 : i32, i32
  }
}

</mosaic_0001>

<bundles_post_ra>
// kernel: _ffn_forward.1
= control target key start
LH: loop header
LB: loop body
LE: loop exit
PB: predicated region body
PF: predicated region fallthrough
CT: control target
= control target key end

     0   :  { %10 = vsyncpa [#allocation4], 0  ;;  %s874_s0 = inlined_call_operand.vmem [shape: bf16[16,256], index: 0, kind: input, shape index: {}]   ;;  %s875_s1 = inlined_call_operand.hbm [shape: bf16[256,256], index: 1, kind: input, shape index: {}]   ;;  %s876_s2 = inlined_call_operand.vmem [shape: f32[1,256], index: 2, kind: input, shape index: {}]   ;;  %s877_s3 = inlined_call_operand.hbm [shape: bf16[256,256], index: 3, kind: input, shape index: {}]   ;;  %s878_s4 = inlined_call_operand.vmem [shape: f32[1,256], index: 4, kind: input, shape index: {}]   ;;  %s879_s5 = inlined_call_operand.vmem [shape: f32[16,256], index: 5, kind: output, shape index: {}]  }
   0x1   :  { %11 = vsyncpa [#allocation6], 0  ;;  %s810_s18 = smov [#allocation3]  }
   0x2   :  { %s19_s19 = sshll.u32 %s810_s18, 4  ;;  %s20_s19 = int_to_ptr.vmem [resolvable:$true] %s19_s19 }
   0x3   :  { %s774_s20 = scalar_lea.vmem %s20_s19, 4096  ;;  %p779_p1 = scmp.lt.s32.totalorder %s20_s19, %s20_s19 }
   0x4   :  { %p775_p0 = scmp.ne.s32.totalorder %s20_s19, %s774_s20  ;;  %p780_p2 = scmp.lt.s32.totalorder %s774_s20, %s774_s20 }
   0x6   :  { %p781_p3 = por %p780_p2, %p779_p1 }
   0x8   :  { %p782_p4 = pnand %p781_p3, %p775_p0 }
   0xa   :  { %785 = shalt.err (!%p782_p4)
}
   0xb   :  { %s811_s21 = smov 128   ;;  %s812_s22 = smov 8  }
   0xc   :  { %25 = dma.hbm_to_vmem [thread:$0]  %s875_s1, 4096, %s20_s19, [#allocation4], %s811_s21, %s811_s21, %s812_s22  }
   0xd   :  { %s813_s25 = smov [#allocation5]  }
   0xe   :  { %s33_s26 = sshll.u32 %s813_s25, 4  ;;  %s34_s26 = int_to_ptr.vmem [resolvable:$true] %s33_s26 }
   0xf   :  { %s794_s27 = scalar_lea.vmem %s34_s26, 4096  ;;  %p799_p6 = scmp.lt.s32.totalorder %s34_s26, %s34_s26 }
  0x10   :  { %p795_p5 = scmp.ne.s32.totalorder %s34_s26, %s794_s27  ;;  %p800_p7 = scmp.lt.s32.totalorder %s794_s27, %s794_s27 }
  0x12   :  { %p801_p8 = por %p800_p7, %p799_p6 }
  0x14   :  { %p802_p9 = pnand %p801_p8, %p795_p5 }
  0x16   :  { %805 = shalt.err (!%p802_p9)
}
  0x17   :  { %39 = dma.hbm_to_vmem [thread:$0]  %s877_s3, 4096, %s34_s26, [#allocation6], %s811_s21, %s811_s21, %s812_s22  }
  0x18   :  { %806 = dma.done.wait [#allocation4], 4096  }
  0x19   :  { %807 = vsyncadd [#allocation4], 4294963200 }
  0x1a   :  { %808 = dma.done.wait [#allocation6], 4096  }
  0x1b   :  { %809 = vsyncadd [#allocation6], 4294963200  ;;  %v667_v0 = vld [vmem:[#allocation3 + $0x74] ss:$8 sps:$4 sm:$0xff]   ;;  %v669_v1 = vld [vmem:[#allocation3 + $0x70] ss:$8 sps:$4 sm:$0xff]  }
  0x1c   :  { %284 = vmatprep.subr.bf16.mxu0 %v667_v0  ;;  %v670_v2 = vld [vmem:[#allocation3 + $0x64] ss:$8 sps:$4 sm:$0xff]   ;;  %v672_v3 = vld [vmem:[#allocation3 + $0x60] ss:$8 sps:$4 sm:$0xff]   ;;  %v673_v4 = vld [vmem:[#allocation3 + $0x54] ss:$8 sps:$4 sm:$0xff]  }
  0x1d   :  { %285 = vmatpush1.bf16.msra.mxu0 %v669_v1  ;;  %v675_v5 = vld [vmem:[#allocation3 + $0x50] ss:$8 sps:$4 sm:$0xff]   ;;  %v676_v6 = vld [vmem:[#allocation3 + $0x44] ss:$8 sps:$4 sm:$0xff]   ;;  %v678_v7 = vld [vmem:[#allocation3 + $0x40] ss:$8 sps:$4 sm:$0xff]  }
  0x1e   :  { %286 = vmatprep.subr.bf16.mxu0 %v670_v2  ;;  %v679_v8 = vld [vmem:[#allocation3 + $0x34] ss:$8 sps:$4 sm:$0xff]   ;;  %v681_v9 = vld [vmem:[#allocation3 + $0x30] ss:$8 sps:$4 sm:$0xff]   ;;  %v682_v10 = vld [vmem:[#allocation3 + $0x24] ss:$8 sps:$4 sm:$0xff]   ;;  %v54_v2 = vlaneseq }
  0x1f   :  { %v684_v11 = vld [vmem:[#allocation3 + $0x20] ss:$8 sps:$4 sm:$0xff]   ;;  %v685_v12 = vld [vmem:[#allocation3 + $0x14] ss:$8 sps:$4 sm:$0xff]   ;;  %v687_v13 = vld [vmem:[#allocation3 + $0x10] ss:$8 sps:$4 sm:$0xff]  }
  0x20   :  { %v688_v14 = vld [vmem:[#allocation3 + $0x4] ss:$8 sps:$4 sm:$0xff]   ;;  %v718_v16 = vld [vmem:[#allocation5 + $0x74] ss:$8 sps:$4 sm:$0xff]   ;;  %v720_v17 = vld [vmem:[#allocation5 + $0x70] ss:$8 sps:$4 sm:$0xff]  }
  0x21   :  { %287 = vmatpush1.bf16.msra.mxu0 %v672_v3  ;;  %v717_v15 = vld [vmem:[%s874_s0 + $0x4] ss:$8 sps:$4 sm:$0xff]   ;;  %529 = vmatprep.subr.bf16.mxu1 %v718_v16  ;;  %v723_v19 = vld [vmem:[#allocation5 + $0x60] ss:$8 sps:$4 sm:$0xff]   ;;  %v724_v21 = vld [vmem:[#allocation5 + $0x54] ss:$8 sps:$4 sm:$0xff]  }
  0x22   :  { %288 = vmatprep.subr.bf16.mxu0 %v673_v4  ;;  %316 = vmatprep.mubr.bf16.mxu0 %v717_v15  ;;  %v721_v18 = vld [vmem:[#allocation5 + $0x64] ss:$8 sps:$4 sm:$0xff]   ;;  %v690_v20 = vld [vmem:[#allocation3] ss:$8 sps:$4 sm:$0xff]   ;;  %v691_v22 = vld [vmem:[#allocation3 + $0xf4] ss:$8 sps:$4 sm:$0xff]  }
  0x23   :  { %530 = vmatpush1.bf16.msra.mxu1 %v720_v17  ;;  %v726_v23 = vld [vmem:[#allocation5 + $0x50] ss:$8 sps:$4 sm:$0xff]   ;;  %v727_v25 = vld [vmem:[#allocation5 + $0x44] ss:$8 sps:$4 sm:$0xff]   ;;  %v729_v27 = vld [vmem:[#allocation5 + $0x40] ss:$8 sps:$4 sm:$0xff]  }
  0x24   :  { %531 = vmatprep.subr.bf16.mxu1 %v721_v18  ;;  %v693_v24 = vld [vmem:[#allocation3 + $0xf0] ss:$8 sps:$4 sm:$0xff]   ;;  %v694_v26 = vld [vmem:[#allocation3 + $0xe4] ss:$8 sps:$4 sm:$0xff]   ;;  %v696_v28 = vld [vmem:[#allocation3 + $0xe0] ss:$8 sps:$4 sm:$0xff]  }
  0x25   :  { %289 = vmatpush1.bf16.msra.mxu0 %v675_v5  ;;  %v730_v29 = vld [vmem:[#allocation5 + $0x34] ss:$8 sps:$4 sm:$0xff]   ;;  %v732_v31 = vld [vmem:[#allocation5 + $0x30] ss:$8 sps:$4 sm:$0xff]   ;;  %v733_v33 = vld [vmem:[#allocation5 + $0x24] ss:$8 sps:$4 sm:$0xff]  }
  0x26   :  { %290 = vmatprep.subr.bf16.mxu0 %v676_v6  ;;  %v697_v30 = vld [vmem:[#allocation3 + $0xd4] ss:$8 sps:$4 sm:$0xff]   ;;  %v699_v32 = vld [vmem:[#allocation3 + $0xd0] ss:$8 sps:$4 sm:$0xff]   ;;  %v700_v34 = vld [vmem:[#allocation3 + $0xc4] ss:$8 sps:$4 sm:$0xff]  }
  0x27   :  { %532 = vmatpush1.bf16.msra.mxu1 %v723_v19  ;;  %v735_v35 = vld [vmem:[#allocation5 + $0x20] ss:$8 sps:$4 sm:$0xff]   ;;  %v736_v37 = vld [vmem:[#allocation5 + $0x14] ss:$8 sps:$4 sm:$0xff]   ;;  %v738_v39 = vld [vmem:[#allocation5 + $0x10] ss:$8 sps:$4 sm:$0xff]  }
  0x28   :  { %533 = vmatprep.subr.bf16.mxu1 %v724_v21  ;;  %v702_v36 = vld [vmem:[#allocation3 + $0xc0] ss:$8 sps:$4 sm:$0xff]   ;;  %v703_v38 = vld [vmem:[#allocation3 + $0xb4] ss:$8 sps:$4 sm:$0xff]   ;;  %v705_v40 = vld [vmem:[#allocation3 + $0xb0] ss:$8 sps:$4 sm:$0xff]  }
  0x29   :  { %291 = vmatpush1.bf16.msra.mxu0 %v678_v7  ;;  %v739_v41 = vld [vmem:[#allocation5 + $0x4] ss:$8 sps:$4 sm:$0xff]   ;;  %v741_v43 = vld [vmem:[#allocation5] ss:$8 sps:$4 sm:$0xff]   ;;  %v742_v45 = vld [vmem:[#allocation5 + $0xf4] ss:$8 sps:$4 sm:$0xff]  }
  0x2a   :  { %292 = vmatprep.subr.bf16.mxu0 %v679_v8  ;;  %v706_v42 = vld [vmem:[#allocation3 + $0xa4] ss:$8 sps:$4 sm:$0xff]   ;;  %v708_v44 = vld [vmem:[#allocation3 + $0xa0] ss:$8 sps:$4 sm:$0xff]   ;;  %v709_v46 = vld [vmem:[#allocation3 + $0x94] ss:$8 sps:$4 sm:$0xff]  }
  0x2b   :  { %534 = vmatpush1.bf16.msra.mxu1 %v726_v23  ;;  %v744_v47 = vld [vmem:[#allocation5 + $0xf0] ss:$8 sps:$4 sm:$0xff]   ;;  %v745_v49 = vld [vmem:[#allocation5 + $0xe4] ss:$8 sps:$4 sm:$0xff]   ;;  %v747_v51 = vld [vmem:[#allocation5 + $0xe0] ss:$8 sps:$4 sm:$0xff]  }
  0x2c   :  { %535 = vmatprep.subr.bf16.mxu1 %v727_v25  ;;  %v711_v48 = vld [vmem:[#allocation3 + $0x90] ss:$8 sps:$4 sm:$0xff]   ;;  %v712_v50 = vld [vmem:[#allocation3 + $0x84] ss:$8 sps:$4 sm:$0xff]   ;;  %v714_v52 = vld [vmem:[#allocation3 + $0x80] ss:$8 sps:$4 sm:$0xff]  }
  0x2d   :  { %293 = vmatpush1.bf16.msra.mxu0 %v681_v9  ;;  %v748_v53 = vld [vmem:[#allocation5 + $0xd4] ss:$8 sps:$4 sm:$0xff]   ;;  %v715_v54 = vld [vmem:[%s874_s0] ss:$8 sps:$4 sm:$0xff]   ;;  %v750_v55 = vld [vmem:[#allocation5 + $0xd0] ss:$8 sps:$4 sm:$0xff]  }
  0x2e   :  { %294 = vmatprep.subr.bf16.mxu0 %v682_v10  ;;  %v751_v56 = vld [vmem:[#allocation5 + $0xc4] ss:$8 sps:$4 sm:$0xff]   ;;  %v753_v57 = vld [vmem:[#allocation5 + $0xc0] ss:$8 sps:$4 sm:$0xff]   ;;  %v754_v58 = vld [vmem:[#allocation5 + $0xb4] ss:$8 sps:$4 sm:$0xff]  }
  0x2f   :  { %536 = vmatpush1.bf16.msra.mxu1 %v729_v27  ;;  %v756_v59 = vld [vmem:[#allocation5 + $0xb0] ss:$8 sps:$4 sm:$0xff]   ;;  %v757_v60 = vld [vmem:[#allocation5 + $0xa4] ss:$8 sps:$4 sm:$0xff]   ;;  %v759_v61 = vld [vmem:[#allocation5 + $0xa0] ss:$8 sps:$4 sm:$0xff]  }
  0x30   :  { %537 = vmatprep.subr.bf16.mxu1 %v730_v29  ;;  %v760_v62 = vld [vmem:[#allocation5 + $0x94] ss:$8 sps:$4 sm:$0xff]   ;;  %v762_v63 = vld [vmem:[#allocation5 + $0x90] ss:$8 sps:$4 sm:$0xff]   ;;  %v763_v0 = vld [vmem:[#allocation5 + $0x84] ss:$8 sps:$4 sm:$0xff]  }
  0x31   :  { %295 = vmatpush1.bf16.msra.mxu0 %v684_v11  ;;  %v765_v1 = vld [vmem:[#allocation5 + $0x80] ss:$8 sps:$4 sm:$0xff]   ;;  %v55_v3 = vshrl.u32 %v54_v2, 7 }
  0x32   :  { %296 = vmatprep.subr.bf16.mxu0 %v685_v12  ;;  %v102_v6 = vld [vmem:[%s876_s2] sm:$0x3] }
  0x33   :  { %538 = vmatpush1.bf16.msra.mxu1 %v732_v31  ;;  %v60_v4 = vsub.s32 1, %v55_v3  ;;  %v56_v5 = vsub.s32 0, %v55_v3  ;;  %v52_v23 = vld [vmem:[%s878_s4] sm:$0x3] }
  0x34   :  { %539 = vmatprep.subr.bf16.mxu1 %v733_v33 }
  0x35   :  { %297 = vmatpush1.bf16.msra.mxu0 %v687_v13  ;;  %v111_v8 = vrot.slane %v102_v6, %v60_v4  ;;  %v107_v9 = vrot.slane %v102_v6, %v56_v5  ;;  %v61_v25 = vrot.slane %v52_v23, %v60_v4 }
  0x36   :  { %298 = vmatprep.subr.bf16.mxu0 %v688_v14 }
  0x37   :  { %540 = vmatpush1.bf16.msra.mxu1 %v735_v35 }
  0x38   :  { %541 = vmatprep.subr.bf16.mxu1 %v736_v37 }
  0x39   :  { %299 = vmatpush1.bf16.msra.mxu0 %v690_v20 }
  0x3a   :  { %300 = vmatprep.subr.bf16.mxu0 %v691_v22 }
  0x3b   :  { %542 = vmatpush1.bf16.msra.mxu1 %v738_v39 }
  0x3c   :  { %543 = vmatprep.subr.bf16.mxu1 %v739_v41 }
  0x3d   :  { %301 = vmatpush2.bf16.msra.mxu0 %v693_v24  ;;  %v57_v24 = vrot.slane %v52_v23, %v56_v5 }
  0x3e   :  { %302 = vmatprep.subr.bf16.mxu0 %v694_v26 }
  0x3f   :  { %544 = vmatpush1.bf16.msra.mxu1 %v741_v43 }
  0x40   :  { %545 = vmatprep.subr.bf16.mxu1 %v742_v45 }
  0x41   :  { %303 = vmatpush2.bf16.msra.mxu0 %v696_v28 }
  0x42   :  { %304 = vmatprep.subr.bf16.mxu0 %v697_v30 }
  0x43   :  { %546 = vmatpush2.bf16.msra.mxu1 %v744_v47 }
  0x44   :  { %547 = vmatprep.subr.bf16.mxu1 %v745_v49 }
  0x45   :  { %305 = vmatpush2.bf16.msra.mxu0 %v699_v32 }
  0x46   :  { %306 = vmatprep.subr.bf16.mxu0 %v700_v34 }
  0x47   :  { %548 = vmatpush2.bf16.msra.mxu1 %v747_v51 }
  0x48   :  { %549 = vmatprep.subr.bf16.mxu1 %v748_v53 }
  0x49   :  { %307 = vmatpush2.bf16.msra.mxu0 %v702_v36 }
  0x4a   :  { %308 = vmatprep.subr.bf16.mxu0 %v703_v38 }
  0x4b   :  { %550 = vmatpush2.bf16.msra.mxu1 %v750_v55 }
  0x4c   :  { %551 = vmatprep.subr.bf16.mxu1 %v751_v56 }
  0x4d   :  { %309 = vmatpush2.bf16.msra.mxu0 %v705_v40 }
  0x4e   :  { %310 = vmatprep.subr.bf16.mxu0 %v706_v42 }
  0x4f   :  { %552 = vmatpush2.bf16.msra.mxu1 %v753_v57 }
  0x50   :  { %553 = vmatprep.subr.bf16.mxu1 %v754_v58 }
  0x51   :  { %311 = vmatpush2.bf16.msra.mxu0 %v708_v44 }
  0x52   :  { %312 = vmatprep.subr.bf16.mxu0 %v709_v46 }
  0x53   :  { %554 = vmatpush2.bf16.msra.mxu1 %v756_v59 }
  0x54   :  { %555 = vmatprep.subr.bf16.mxu1 %v757_v60 }
  0x55   :  { %313 = vmatpush2.bf16.msra.mxu0 %v711_v48 }
  0x56   :  { %314 = vmatprep.subr.bf16.mxu0 %v712_v50 }
  0x57   :  { %556 = vmatpush2.bf16.msra.mxu1 %v759_v61 }
  0x58   :  { %557 = vmatprep.subr.bf16.mxu1 %v760_v62 }
  0x59   :  { %315 = vmatpush2.bf16.msra.mxu0 %v714_v52 }
  0x5b   :  { %558 = vmatpush2.bf16.msra.mxu1 %v762_v63 }
  0x5c   :  { %317 = vmatmul.mubr.bf16.vlgmr.msra.gmra.mxu0 %v715_v54  ;;  %559 = vmatprep.subr.bf16.mxu1 %v763_v0 }
  0x5f   :  { %560 = vmatpush2.bf16.msra.mxu1 %v765_v1 }
 0x11c   :  { %v318_v7 = vpop.f32.mrf.mxu0 }
 0x11d   :  { %v319_v14 = vadd.f32 %v318_v7, %v107_v9 }
 0x11e   :  { %v320_v10 = vpop.f32.mrf.mxu0 }
 0x11f   :  { %v321_v12 = vadd.f32 %v320_v10, %v111_v8  ;;  %v327_v20 = vmax.f32 %v319_v14, 0.0 }
 0x120   :  { %v322_v11 = vpop.f32.mrf.mxu0 }
 0x121   :  { %v323_v13 = vadd.f32 %v322_v11, %v107_v9  ;;  %v328_v18 = vmax.f32 %v321_v12, 0.0 }
 0x122   :  { %v324_v15 = vpop.f32.mrf.mxu0 }
 0x123   :  { %v325_v16 = vadd.f32 %v324_v15, %v111_v8  ;;  %v329_v17 = vmax.f32 %v323_v13, 0.0 }
 0x125   :  { %v330_v19 = vmax.f32 %v325_v16, 0.0  ;;  %v335_v22 = vpack.c.bf16 %v329_v17, %v327_v20 }
 0x127   :  { %v336_v21 = vpack.c.bf16 %v330_v19, %v328_v18 }
 0x129   :  { %561 = vmatprep.mubr.bf16.mxu1 %v336_v21 }
 0x12a   :  { %562 = vmatmul.mubr.bf16.vlgmr.msra.gmra.mxu1 %v335_v22 }
 0x1ea   :  { %v563_v26 = vpop.f32.mrf.mxu1 }
 0x1eb   :  { %v572_v27 = vadd.f32 %v563_v26, %v57_v24 }
 0x1ec   :  { %v565_v28 = vpop.f32.mrf.mxu1 }
 0x1ed   :  { %587 = vst [vmem:[%s879_s5] sm:$0xff] %v572_v27  ;;  %v573_v29 = vadd.f32 %v565_v28, %v61_v25 }
 0x1ee   :  { %v567_v30 = vpop.f32.mrf.mxu1 }
 0x1ef   :  { %588 = vst [vmem:[%s879_s5 + $0x8] sm:$0xff] %v573_v29  ;;  %v574_v31 = vadd.f32 %v567_v30, %v57_v24 }
 0x1f0   :  { %v569_v32 = vpop.f32.mrf.mxu1 }
 0x1f1   :  { %589 = vst [vmem:[%s879_s5 + $0x10] sm:$0xff] %v574_v31  ;;  %v575_v33 = vadd.f32 %v569_v32, %v61_v25 }
 0x1f3   :  { %590 = vst [vmem:[%s879_s5 + $0x18] sm:$0xff] %v575_v33 }
 0x1f4   :  { %595 = vsyncpa [#allocation4], 1 }
 0x1f5   :  { %596 = vsyncpa [#allocation6], 1 }

</bundles_post_ra>
